<compile_context>
chip_gen: v5e
topology: v5e:2x2
jax: 0.10.0
libtpu: 0.0.40
codegen_flags: <defaults>
</compile_context>

<pallas_src>
import jax
import jax.numpy as jnp
from jax import lax
from jax.experimental import pallas as pl
from jax.experimental.pallas import tpu as pltpu

BN_EPS = 1e-5
LEAKY_SLOPE = 0.1
LANE = 128
TP_ALIGN = 16          # sublane alignment safe for bf16-packed tiles
VMEM_LIMIT = 32 * 1024 * 1024


def _round_up(x, m):
    return (x + m - 1) // m * m


# ---------------------------------------------------------------------------
# Pass 1: conv tile + per-channel sum / sum-of-squares (resident accumulator).
# ---------------------------------------------------------------------------
def _conv_stats_kernel(patches_ref, w_ref, stats_ref):
    """patches: (tp, K)  w: (K, Cp)  stats: (8, Cp) resident across the grid."""
    @pl.when(pl.program_id(0) == 0)
    def _():
        stats_ref[...] = jnp.zeros_like(stats_ref)

    conv = jnp.dot(patches_ref[...], w_ref[...],
                   preferred_element_type=jnp.float32)            # MXU, f32 acc
    stats_ref[0:1, :] += jnp.sum(conv, axis=0, keepdims=True)           # sum
    stats_ref[1:2, :] += jnp.sum(conv * conv, axis=0, keepdims=True)    # sum sq


# ---------------------------------------------------------------------------
# Pass 2: recompute conv tile, folded BN affine + LeakyReLU, lane-dense store.
# ---------------------------------------------------------------------------
def _conv_bn_act_kernel(patches_ref, w_ref, affine_ref, out_ref):
    """patches: (tp, K)  w: (K, Cp)  affine: (2, Cp)  out: (tp, Cp)."""
    conv = jnp.dot(patches_ref[...], w_ref[...],
                   preferred_element_type=jnp.float32)
    scale = affine_ref[0:1, :]          # (1, Cp) broadcasts against (tp, Cp)
    shift = affine_ref[1:2, :]
    y = conv * scale + shift            # BN folded into one FMA-style pass
    out_ref[...] = jnp.where(y > 0, y, LEAKY_SLOPE * y)


# ---------------------------------------------------------------------------
# Host-side glue
# ---------------------------------------------------------------------------
def _im2col_nhwc(x_nhwc, kh, kw):
    """(N,H,W,C) -> (N*Ho*Wo, kh*kw*C) for stride=1, padding=0."""
    N, H, W, C = x_nhwc.shape
    Ho, Wo = H - kh + 1, W - kw + 1
    pieces = []
    for i in range(kh):
        for j in range(kw):
            pieces.append(x_nhwc[:, i:i + Ho, j:j + Wo, :])
    patches = jnp.concatenate(pieces, axis=-1)            # (N, Ho, Wo, kh*kw*C)
    return patches.reshape(N * Ho * Wo, kh * kw * C), (N, Ho, Wo)


def _choose_tile_p(P, K, cout_pad, in_itemsize, vmem_budget_bytes=20 << 20):
    """Largest P-tile whose double-buffered working set stays well under the
    explicit 32 MiB scoped-VMEM limit (leaves headroom; safe on v7x's 64 MiB)."""
    fixed = 2 * (K * cout_pad * in_itemsize + 2 * cout_pad * 4)   # weights + affine
    avail = max(vmem_budget_bytes - fixed, 1 << 20)
    per_row = 2 * (K * in_itemsize + cout_pad * 4)                # patches + out rows
    tp = int(max(TP_ALIGN, min(1024, avail // per_row)))
    tp -= tp % TP_ALIGN
    return max(TP_ALIGN, min(tp, _round_up(P, TP_ALIGN)))


def cnn_block_forward(x_nchw, conv_w, conv_b, bn_gamma, bn_beta,
                      kernel_size=3, compute_dtype=jnp.bfloat16, tile_p=None):
    """Forward pass matching the PyTorch CnnBlock (training-mode BatchNorm).

    x_nchw: (N, Cin, H, W)  conv_w: (Cout, Cin, kh, kw)  conv_b: (Cout,)
    Returns (N, Cout, Ho, Wo) float32.

    conv_b is accepted for API parity but is NOT applied: under training-mode
    BatchNorm the bias shifts the conv output and its batch mean equally, so it
    cancels exactly in the forward result.
    """
    kh = kw = kernel_size
    Cout = conv_w.shape[0]
    cout_pad = _round_up(Cout, LANE)

    # ---- glue: NCHW -> NHWC, im2col, weight relayout, padding (plain JAX) ----
    x_nhwc = jnp.transpose(x_nchw, (0, 2, 3, 1)).astype(compute_dtype)
    patches, (N, Ho, Wo) = _im2col_nhwc(x_nhwc, kh, kw)        # (P, K)
    P, K = patches.shape

    in_itemsize = jnp.dtype(compute_dtype).itemsize
    tp = tile_p if tile_p is not None else _choose_tile_p(P, K, cout_pad, in_itemsize)
    tp = max(TP_ALIGN, min(tp, _round_up(P, TP_ALIGN)))
    tp -= tp % TP_ALIGN
    P_pad = _round_up(P, tp)
    num_tiles = P_pad // tp
    if P_pad != P:
        patches = jnp.pad(patches, ((0, P_pad - P), (0, 0)))   # zero rows: no effect on stats

    # (Cout, Cin, kh, kw) -> (kh, kw, Cin, Cout) -> (K, Cout) -> pad to (K, Cp)
    w2d = jnp.transpose(conv_w, (2, 3, 1, 0)).reshape(K, Cout)
    w2d = jnp.pad(w2d, ((0, 0), (0, cout_pad - Cout))).astype(compute_dtype)
    gamma_p = jnp.pad(bn_gamma.astype(jnp.float32), (0, cout_pad - Cout))
    beta_p = jnp.pad(bn_beta.astype(jnp.float32), (0, cout_pad - Cout))

    # ---- pass 1: per-channel sum / sum-of-squares over all P rows ----
    stats = pl.pallas_call(
        _conv_stats_kernel,
        out_shape=jax.ShapeDtypeStruct((8, cout_pad), jnp.float32),
        grid_spec=pltpu.PrefetchScalarGridSpec(
            num_scalar_prefetch=0,
            grid=(num_tiles,),
            in_specs=[
                pl.BlockSpec((tp, K), lambda i: (i, 0)),
                pl.BlockSpec((K, cout_pad), lambda i: (0, 0)),   # weights resident
            ],
            out_specs=pl.BlockSpec((8, cout_pad), lambda i: (0, 0)),
        ),
        compiler_params=pltpu.CompilerParams(
            dimension_semantics=("arbitrary",),        # resident accumulator axis
            vmem_limit_bytes=VMEM_LIMIT),
    )(patches, w2d)

    # ---- glue: fold BN into one per-channel scale/shift (divide by true P;
    #      zero-padded rows contributed 0 to both sums) ----
    inv_p = 1.0 / float(P)
    mean = stats[0] * inv_p
    var = jnp.maximum(stats[1] * inv_p - mean * mean, 0.0)     # biased batch var
    scale = gamma_p * lax.rsqrt(var + BN_EPS)
    shift = beta_p - mean * scale
    affine = jnp.stack([scale, shift], axis=0)                 # (2, Cp) f32

    # ---- pass 2: recompute conv, apply affine + LeakyReLU, lane-dense store ----
    out_flat = pl.pallas_call(
        _conv_bn_act_kernel,
        out_shape=jax.ShapeDtypeStruct((P_pad, cout_pad), jnp.float32),
        grid_spec=pltpu.PrefetchScalarGridSpec(
            num_scalar_prefetch=0,
            grid=(num_tiles,),
            in_specs=[
                pl.BlockSpec((tp, K), lambda i: (i, 0)),
                pl.BlockSpec((K, cout_pad), lambda i: (0, 0)),
                pl.BlockSpec((2, cout_pad), lambda i: (0, 0)),
            ],
            out_specs=pl.BlockSpec((tp, cout_pad), lambda i: (i, 0)),
        ),
        compiler_params=pltpu.CompilerParams(
            dimension_semantics=("parallel",),         # independent tiles (megacore)
            vmem_limit_bytes=VMEM_LIMIT),
    )(patches, w2d, affine)

    # ---- glue: strip padding, back to NCHW ----
    out_nhwc = out_flat[:P, :Cout].reshape(N, Ho, Wo, Cout)
    return jnp.transpose(out_nhwc, (0, 3, 1, 2))


def _reference_forward(x_nchw, conv_w, conv_b, bn_gamma, bn_beta):
    """Pure-JAX f32 reference (NCHW conv + bias + training-mode BN + LeakyReLU)."""
    conv = lax.conv_general_dilated(
        x_nchw, conv_w, window_strides=(1, 1), padding="VALID",
        dimension_numbers=("NCHW", "OIHW", "NCHW"))
    conv = conv + conv_b[None, :, None, None]
    mean = jnp.mean(conv, axis=(0, 2, 3), keepdims=True)
    var = jnp.mean((conv - mean) ** 2, axis=(0, 2, 3), keepdims=True)
    normed = (conv - mean) * lax.rsqrt(var + BN_EPS)
    normed = normed * bn_gamma[None, :, None, None] + bn_beta[None, :, None, None]
    return jnp.where(normed > 0, normed, LEAKY_SLOPE * normed)


if __name__ == "__main__":
    # Small shapes consistent with the module: N=2, Cin=4, Cout=8, H=W=16, k=3
    N, Cin, Cout, H, W, ksz = 2, 4, 8, 16, 16, 3

    key = jax.random.PRNGKey(0)
    kx, kw_, kb = jax.random.split(key, 3)

    x = jax.random.normal(kx, (N, Cin, H, W), dtype=jnp.float32)
    fan_in = Cin * ksz * ksz
    bound = 1.0 / (fan_in ** 0.5)
    conv_w = jax.random.uniform(kw_, (Cout, Cin, ksz, ksz),
                                minval=-bound, maxval=bound, dtype=jnp.float32)
    conv_b = jax.random.uniform(kb, (Cout,),
                                minval=-bound, maxval=bound, dtype=jnp.float32)
    bn_gamma = jnp.ones((Cout,), jnp.float32)
    bn_beta = jnp.zeros((Cout,), jnp.float32)

    ref = _reference_forward(x, conv_w, conv_b, bn_gamma, bn_beta)

    # f32 compute path: tight parity with the PyTorch forward.
    out_f32 = cnn_block_forward(x, conv_w, conv_b, bn_gamma, bn_beta,
                                kernel_size=ksz, compute_dtype=jnp.float32,
                                tile_p=128)
    out_f32 = jax.block_until_ready(out_f32)
    assert out_f32.shape == (N, Cout, H - ksz + 1, W - ksz + 1), out_f32.shape
    assert jnp.allclose(out_f32, ref, atol=1e-4, rtol=1e-4), "f32 mismatch vs reference"

    # bf16 MXU-input path (performance default): f32 accumulation/epilogue,
    # checked against the f32 reference at bf16-appropriate tolerance.
    out_bf16 = cnn_block_forward(x, conv_w, conv_b, bn_gamma, bn_beta,
                                 kernel_size=ksz, compute_dtype=jnp.bfloat16,
                                 tile_p=128)
    out_bf16 = jax.block_until_ready(out_bf16)
    assert jnp.allclose(out_bf16, ref, atol=5e-2, rtol=5e-2), "bf16 mismatch vs reference"

    print("KERNEL_OK")
</pallas_src>

<mosaic_0001>
module attributes {stable_mosaic.version = 11 : i64} {
  func.func @_conv_stats_kernel(%arg0: i32, %arg1: memref<128x36xf32, #tpu.memory_space<vmem>>, %arg2: memref<36x128xf32, #tpu.memory_space<vmem>>, %arg3: memref<8x128xf32, #tpu.memory_space<vmem>>) attributes {dimension_semantics = [#tpu.dimension_semantics<arbitrary>], iteration_bounds = array<i64: 4>, scalar_prefetch = 0 : i64, scratch_operands = 0 : i64, tpu.core_type = #tpu.core_type<tc>, window_params = [{transform_indices = @transform_0, window_bounds = array<i64: 128, 36>}, {pipeline_mode = #tpu.pipeline_mode<synchronous>, transform_indices = @transform_1, window_bounds = array<i64: 36, 128>}, {pipeline_mode = #tpu.pipeline_mode<synchronous>, transform_indices = @transform_2, window_bounds = array<i64: 8, 128>}]} {
    %c0_i32 = arith.constant 0 : i32
    %0 = arith.cmpi eq, %arg0, %c0_i32 : i32
    %1 = arith.extui %0 : i1 to i32
    %c0_i32_0 = arith.constant 0 : i32
    %2 = arith.cmpi ne, %1, %c0_i32_0 : i32
    scf.if %2 {
      %cst_13 = arith.constant 0.000000e+00 : f32
      %17 = vector.broadcast %cst_13 : f32 to vector<8x128xf32>
      %c0_14 = arith.constant 0 : index
      %c0_15 = arith.constant 0 : index
      %18 = vector.load %arg3[%c0_14, %c0_15] : memref<8x128xf32, #tpu.memory_space<vmem>>, vector<8x128xf32>
      tpu.vector_store %arg3[%c0_14, %c0_15], %17 {strides = array<i32>} : memref<8x128xf32, #tpu.memory_space<vmem>>, vector<8x128xf32>,
    } else {
    }
    %c0 = arith.constant 0 : index
    %c0_1 = arith.constant 0 : index
    %3 = vector.load %arg1[%c0, %c0_1] : memref<128x36xf32, #tpu.memory_space<vmem>>, vector<128x36xf32>
    %c0_2 = arith.constant 0 : index
    %c0_3 = arith.constant 0 : index
    %4 = vector.load %arg2[%c0_2, %c0_3] : memref<36x128xf32, #tpu.memory_space<vmem>>, vector<36x128xf32>
    %cst = arith.constant dense<0.000000e+00> : vector<128x128xf32>
    %5 = tpu.matmul %3, %4, %cst {dimension_numbers = #tpu.dot_dimension_numbers<[1], [0], [0], [1], [0, 0, 1, 1], [], []>} : vector<128x36xf32>, vector<36x128xf32>, vector<128x128xf32> -> vector<128x128xf32>
    %c0_4 = arith.constant 0 : index
    %c0_5 = arith.constant 0 : index
    %6 = vector.load %arg3[%c0_4, %c0_5] : memref<8x128xf32, #tpu.memory_space<vmem>>, vector<1x128xf32>
    %cst_6 = arith.constant dense<0.000000e+00> : vector<128xf32>
    %7 = vector.multi_reduction <add>, %5, %cst_6 [0] : vector<128x128xf32> to vector<128xf32>
    %8 = vector.shape_cast %7 : vector<128xf32> to vector<1x128xf32>
    %9 = arith.addf %6, %8 : vector<1x128xf32>
    %c0_7 = arith.constant 0 : index
    %c0_8 = arith.constant 0 : index
    %10 = vector.load %arg3[%c0_7, %c0_8] : memref<8x128xf32, #tpu.memory_space<vmem>>, vector<1x128xf32>
    tpu.vector_store %arg3[%c0_7, %c0_8], %9 {strides = array<i32>} : memref<8x128xf32, #tpu.memory_space<vmem>>, vector<1x128xf32>,
    %c1 = arith.constant 1 : index
    %c0_9 = arith.constant 0 : index
    %11 = vector.load %arg3[%c1, %c0_9] : memref<8x128xf32, #tpu.memory_space<vmem>>, vector<1x128xf32>
    %12 = arith.mulf %5, %5 : vector<128x128xf32>
    %cst_10 = arith.constant dense<0.000000e+00> : vector<128xf32>
    %13 = vector.multi_reduction <add>, %12, %cst_10 [0] : vector<128x128xf32> to vector<128xf32>
    %14 = vector.shape_cast %13 : vector<128xf32> to vector<1x128xf32>
    %15 = arith.addf %11, %14 : vector<1x128xf32>
    %c1_11 = arith.constant 1 : index
    %c0_12 = arith.constant 0 : index
    %16 = vector.load %arg3[%c1_11, %c0_12] : memref<8x128xf32, #tpu.memory_space<vmem>>, vector<1x128xf32>
    tpu.vector_store %arg3[%c1_11, %c0_12], %15 {strides = array<i32>} : memref<8x128xf32, #tpu.memory_space<vmem>>, vector<1x128xf32>,
    return
  }
  func.func @transform_0(%arg0: i32) -> (i32, i32) {
    %c0_i32 = arith.constant 0 : i32
    %c0_i32_0 = arith.constant 0 : i32
    return %arg0, %c0_i32 : i32, i32
  }
  func.func @transform_1(%arg0: i32) -> (i32, i32) {
    %c0_i32 = arith.constant 0 : i32
    %c0_i32_0 = arith.constant 0 : i32
    %c0_i32_1 = arith.constant 0 : i32
    return %c0_i32, %c0_i32_0 : i32, i32
  }
  func.func @transform_2(%arg0: i32) -> (i32, i32) {
    %c0_i32 = arith.constant 0 : i32
    %c0_i32_0 = arith.constant 0 : i32
    %c0_i32_1 = arith.constant 0 : i32
    return %c0_i32, %c0_i32_0 : i32, i32
  }
}

</mosaic_0001>

<bundles_post_ra>
// kernel: tpu_custom_call.1
= control target key start
LH: loop header
LB: loop body
LE: loop exit
PB: predicated region body
PF: predicated region fallthrough
CT: control target
= control target key end

     0   :  { %7 = vsyncpa [#allocation3], 0  ;;  %s504_s9 = smov 0   ;;  %s575_s0 = inlined_call_operand.vmem [shape: f32[512,36], index: 0, kind: input, shape index: {}]   ;;  %s576_s1 = inlined_call_operand.vmem [shape: f32[36,128], index: 1, kind: input, shape index: {}]   ;;  %s577_s2 = inlined_call_operand.hbm [shape: f32[8,128], index: 2, kind: output, shape index: {}]  }
   0x1 LB: > { %s510_s10 = sadd.s32 4294967295, %s485_s9   ;;  %p391_p0 = scmp.ge.s32.totalorder %s485_s9, 1  ;;  %s485_s9 = sphi %s504_s9, %s13_s9  }
   0x2   : > { %p109_p1 = scmp.lt.s32.totalorder %s485_s9, 5 }
   0x4   : > { %p110_p2 = pnand %p391_p0, %p109_p1 }
   0x5   : > { %s392_s11 = sshll.u32 (!%p110_p2), %s510_s10, 4  ;;  %p394_p4 = scmp.ne.s32.totalorder (!%p110_p2), %s510_s10, 0 }
   0x6   : > { %113 = sbr.rel (%p110_p2) target bundleno = 224 (0xe0), region = 28  ;;  %p127_p3 = scmp.lt.s32.totalorder (!%p110_p2), %s392_s11, 63 }
   0xb   : > { %s579_s11 = smov (!%p127_p3, %s392_s11), 63  ;;  %135 = sbr.rel (%p394_p4) target bundleno = 18 (0x12), region = 32 }
   0xc   : > { %s393_s12 = sshll.u32 %s579_s11, 3 }
   0xd   : > { %s518_s15 = scalar_lea.vmem %s575_s0, %s393_s12 }
  0x10   : > { %v487_v0 = vmov 0.0  }
  0x11   : > { %136 = vst [vmem:[#allocation2] sm:$0xff] %v487_v0 }
  0x12 PF: > { %v157_v1 = vld [vmem:[%s576_s1 + $0x20] sm:$0xf]  ;;  %vm207_vm0 = vcmask 1043456   ;;  %v156_v2 = vld [vmem:[%s576_s1 + $0x18] sm:$0xff]  ;;  %v155_v3 = vld [vmem:[%s576_s1 + $0x10] sm:$0xff]  ;;  %vm158_vm1 = vcmask 293888  }
  0x13   : > { %395 = vmatpush.msk.msra.mxu0 %vm207_vm0, %v157_v1  ;;  %416 = vmatpush.msk.msra.mxu1 %vm207_vm0, %v157_v1  ;;  %v154_v4 = vld [vmem:[%s576_s1 + $0x8] sm:$0xff]  ;;  %v153_v5 = vld [vmem:[%s576_s1] sm:$0xff]  ;;  %v139_v14 = vld [vmem:[%s518_s15 + $0x10] sm:$0xff]  ;;  %s488_s26 = smov [#allocation2]   ;;  %s348_s30 = sshll.u32 %s577_s2, 4  ;;  %s349_s30 = int_to_ptr.hbm [resolvable:$true] %s348_s30 }
  0x14   : > { %417 = vmatpush.msk.msra.mxu2 %vm207_vm0, %v157_v1  ;;  %418 = vmatpush.msk.msra.mxu3 %vm207_vm0, %v157_v1  ;;  %v137_v6 = vld [vmem:[%s518_s15] sm:$0xff]  ;;  %v138_v10 = vld [vmem:[%s518_s15 + $0x8] sm:$0xff]  ;;  %v143_v15 = vld [vmem:[%s518_s15 + $0x30] sm:$0xff]  ;;  %s346_s27 = sshll.u32 %s488_s26, 4  ;;  %p435_p5 = scmp.eq.s32.totalorder %s510_s10, 3  ;;  %s347_s27 = int_to_ptr.vmem [resolvable:$true] %s346_s27 }
  0x15   : > { %223 = vmatpush.msra.mxu0 %v156_v2  ;;  %419 = vmatpush.msra.mxu1 %v156_v2  ;;  %v141_v7 = vld [vmem:[%s518_s15 + $0x20] sm:$0xff]  ;;  %v142_v11 = vld [vmem:[%s518_s15 + $0x28] sm:$0xff]  ;;  %v147_v16 = vld [vmem:[%s518_s15 + $0x50] sm:$0xff] }
  0x16   : > { %420 = vmatpush.msra.mxu2 %v156_v2  ;;  %421 = vmatpush.msra.mxu3 %v156_v2  ;;  %v145_v8 = vld [vmem:[%s518_s15 + $0x40] sm:$0xff]  ;;  %v146_v12 = vld [vmem:[%s518_s15 + $0x48] sm:$0xff]  ;;  %v151_v17 = vld [vmem:[%s518_s15 + $0x70] sm:$0xff] }
  0x17   : > { %224 = vmatpush.msra.mxu0 %v155_v3  ;;  %422 = vmatpush.msra.mxu1 %v155_v3  ;;  %v149_v9 = vld [vmem:[%s518_s15 + $0x60] sm:$0xff]  ;;  %v150_v13 = vld [vmem:[%s518_s15 + $0x68] sm:$0xff]  ;;  %v140_v18 = vld [vmem:[%s518_s15 + $0x18] sm:$0xff] }
  0x18   : > { %423 = vmatpush.msra.mxu2 %v155_v3  ;;  %424 = vmatpush.msra.mxu3 %v155_v3  ;;  %v144_v19 = vld [vmem:[%s518_s15 + $0x38] sm:$0xff] }
  0x19   : > { %225 = vmatpush.msra.mxu0 %v154_v4  ;;  %425 = vmatpush.msra.mxu1 %v154_v4  ;;  %v148_v20 = vld [vmem:[%s518_s15 + $0x58] sm:$0xff] }
  0x1a   : > { %426 = vmatpush.msra.mxu2 %v154_v4  ;;  %427 = vmatpush.msra.mxu3 %v154_v4  ;;  %v152_v21 = vld [vmem:[%s518_s15 + $0x78] sm:$0xff] }
  0x1b   : > { %226 = vmatpush.msra.mxu0 %v153_v5  ;;  %428 = vmatpush.msra.mxu1 %v153_v5 }
  0x1c   : > { %396 = vmatmul.msk.f32.vlgmr.msra.gmra.mxu0 %vm158_vm1, %v137_v6  ;;  %400 = vmatmul.msk.f32.vlgmr.msra.gmra.mxu1 %vm158_vm1, %v141_v7 }
  0x1d   : > { %429 = vmatpush.msra.mxu2 %v153_v5  ;;  %430 = vmatpush.msra.mxu3 %v153_v5 }
  0x1e   : > { %404 = vmatmul.msk.f32.vlgmr.msra.gmra.mxu2 %vm158_vm1, %v145_v8  ;;  %408 = vmatmul.msk.f32.vlgmr.msra.gmra.mxu3 %vm158_vm1, %v149_v9 }
  0x24   : > { %397 = vmatmul.msk.f32.gmra.mxu0 %vm158_vm1, %v138_v10  ;;  %401 = vmatmul.msk.f32.gmra.mxu1 %vm158_vm1, %v142_v11 }
  0x26   : > { %405 = vmatmul.msk.f32.gmra.mxu2 %vm158_vm1, %v146_v12  ;;  %409 = vmatmul.msk.f32.gmra.mxu3 %vm158_vm1, %v150_v13 }
  0x2c   : > { %398 = vmatmul.msk.f32.gmra.mxu0 %vm158_vm1, %v139_v14  ;;  %402 = vmatmul.msk.f32.gmra.mxu1 %vm158_vm1, %v143_v15 }
  0x2e   : > { %406 = vmatmul.msk.f32.gmra.mxu2 %vm158_vm1, %v147_v16  ;;  %410 = vmatmul.msk.f32.gmra.mxu3 %vm158_vm1, %v151_v17 }
  0x34   : > { %399 = vmatmul.msk.f32.gmra.mxu0 %vm158_vm1, %v140_v18  ;;  %403 = vmatmul.msk.f32.gmra.mxu1 %vm158_vm1, %v144_v19 }
  0x36   : > { %407 = vmatmul.msk.f32.gmra.mxu2 %vm158_vm1, %v148_v20  ;;  %411 = vmatmul.msk.f32.gmra.mxu3 %vm158_vm1, %v152_v21 }
  0x99   : > { %v228_v22 = vpop.f32.mrf.mxu0  ;;  %v240_v23 = vpop.f32.mrf.mxu1 }
  0x9a   : > { %v301_v32 = vmul.f32 %v228_v22, %v228_v22  ;;  %v305_v43 = vmul.f32 %v240_v23, %v240_v23 }
  0xa1   : > { %v231_v24 = vpop.f32.mrf.mxu0  ;;  %v243_v25 = vpop.f32.mrf.mxu1 }
  0xa2   : > { %v252_v26 = vpop.f32.mrf.mxu2  ;;  %v264_v27 = vpop.f32.mrf.mxu3  ;;  %v302_v31 = vmul.f32 %v231_v24, %v231_v24  ;;  %v277_v33 = vadd.f32 %v231_v24, %v228_v22  ;;  %v306_v47 = vmul.f32 %v243_v25, %v243_v25 }
  0xa3   : > { %v309_v57 = vmul.f32 %v252_v26, %v252_v26  ;;  %v313_v6 = vmul.f32 %v264_v27, %v264_v27 }
  0xa4   : > { %v317_v35 = vadd.f32 %v302_v31, %v301_v32  ;;  %v300_v32 = vld [vmem:[#allocation2 + $0x1] sm:$0x1] }
  0xa9   : > { %v234_v28 = vpop.f32.mrf.mxu0  ;;  %v246_v30 = vpop.f32.mrf.mxu1 }
  0xaa   : > { %v255_v29 = vpop.f32.mrf.mxu2  ;;  %v303_v34 = vmul.f32 %v234_v28, %v234_v28  ;;  %v278_v36 = vadd.f32 %v277_v33, %v234_v28  ;;  %v267_v38 = vpop.f32.mrf.mxu3  ;;  %v307_v51 = vmul.f32 %v246_v30, %v246_v30 }
  0xab   : > { %v310_v61 = vmul.f32 %v255_v29, %v255_v29  ;;  %v314_v10 = vmul.f32 %v267_v38, %v267_v38 }
  0xac   : > { %v318_v39 = vadd.f32 %v317_v35, %v303_v34 }
  0xb1   : > { %v237_v37 = vpop.f32.mrf.mxu0  ;;  %v249_v46 = vpop.f32.mrf.mxu1 }
  0xb2   : > { %v279_v40 = vadd.f32 %v278_v36, %v237_v37  ;;  %v304_v41 = vmul.f32 %v237_v37, %v237_v37  ;;  %v258_v42 = vpop.f32.mrf.mxu2  ;;  %v308_v53 = vmul.f32 %v249_v46, %v249_v46  ;;  %v270_v56 = vpop.f32.mrf.mxu3 }
  0xb3   : > { %v311_v1 = vmul.f32 %v258_v42, %v258_v42  ;;  %v315_v14 = vmul.f32 %v270_v56, %v270_v56 }
  0xb4   : > { %v280_v44 = vadd.f32 %v279_v40, %v240_v23  ;;  %v319_v45 = vadd.f32 %v318_v39, %v304_v41 }
  0xb6   : > { %v320_v48 = vadd.f32 %v319_v45, %v305_v43  ;;  %v281_v49 = vadd.f32 %v280_v44, %v243_v25 }
  0xb8   : > { %v282_v50 = vadd.f32 %v281_v49, %v246_v30  ;;  %v321_v52 = vadd.f32 %v320_v48, %v306_v47 }
  0xba   : > { %v322_v54 = vadd.f32 %v321_v52, %v307_v51  ;;  %v283_v55 = vadd.f32 %v282_v50, %v249_v46  ;;  %v261_v60 = vpop.f32.mrf.mxu2  ;;  %v273_v9 = vpop.f32.mrf.mxu3 }
  0xbb   : > { %v312_v3 = vmul.f32 %v261_v60, %v261_v60  ;;  %v316_v16 = vmul.f32 %v273_v9, %v273_v9 }
  0xbc   : > { %v284_v58 = vadd.f32 %v283_v55, %v252_v26  ;;  %v323_v59 = vadd.f32 %v322_v54, %v308_v53 }
  0xbe   : > { %v324_v62 = vadd.f32 %v323_v59, %v309_v57  ;;  %v285_v63 = vadd.f32 %v284_v58, %v255_v29  ;;  %v276_v29 = vld [vmem:[#allocation2] sm:$0x1] }
  0xc0   : > { %v286_v0 = vadd.f32 %v285_v63, %v258_v42  ;;  %v325_v2 = vadd.f32 %v324_v62, %v310_v61 }
  0xc2   : > { %v326_v4 = vadd.f32 %v325_v2, %v311_v1  ;;  %v287_v5 = vadd.f32 %v286_v0, %v261_v60 }
  0xc4   : > { %v288_v7 = vadd.f32 %v287_v5, %v264_v27  ;;  %v327_v8 = vadd.f32 %v326_v4, %v312_v3 }
  0xc6   : > { %v328_v11 = vadd.f32 %v327_v8, %v313_v6  ;;  %v289_v12 = vadd.f32 %v288_v7, %v267_v38 }
  0xc8   : > { %v290_v13 = vadd.f32 %v289_v12, %v270_v56  ;;  %v329_v15 = vadd.f32 %v328_v11, %v314_v10 }
  0xca   : > { %v330_v17 = vadd.f32 %v329_v15, %v315_v14  ;;  %v291_v18 = vadd.f32 %v290_v13, %v273_v9 }
  0xcc   : > { %v292_v19 = vrot.slane %v291_v18, 4  ;;  %v331_v20 = vadd.f32 %v330_v17, %v316_v16 }
  0xce   : > { %v293_v21 = vadd.f32 %v292_v19, %v291_v18  ;;  %v332_v22 = vrot.slane %v331_v20, 4 }
  0xd0   : > { %v294_v23 = vrot.slane %v293_v21, 2  ;;  %v333_v24 = vadd.f32 %v332_v22, %v331_v20 }
  0xd2   : > { %v295_v25 = vadd.f32 %v294_v23, %v293_v21  ;;  %v334_v26 = vrot.slane %v333_v24, 2 }
  0xd4   : > { %v296_v27 = vrot.slane %v295_v25, 1  ;;  %v335_v28 = vadd.f32 %v334_v26, %v333_v24 }
  0xd6   : > { %v297_v30 = vadd.f32 %v296_v27, %v295_v25  ;;  %v336_v31 = vrot.slane %v335_v28, 1 }
  0xd8   : > { %v337_v33 = vadd.f32 %v336_v31, %v335_v28  ;;  %v298_v34 = vadd.f32 %v297_v30, %v276_v29 }
  0xda   : > { %299 = vst [vmem:[#allocation2] sm:$0x1] %v298_v34  ;;  %v338_v35 = vadd.f32 %v337_v33, %v300_v32 }
  0xdc   : > { %339 = vst [vmem:[#allocation2 + $0x1] sm:$0x1] %v338_v35 }
  0xdd   : > { %432 = dma.vmem_to_hbm [thread:$0]  (%p435_p5), %s347_s27, 128, %s349_s30, [#allocation3]  }
  0xde   : > { %480 = dma.done.wait (%p435_p5), [#allocation3], 128  }
  0xdf   : > { %482 = vsyncadd (%p435_p5), [#allocation3], 4294967168 }
  0xe0 PF: > { %s13_s9 = sadd.s32 1, %s485_s9  }
  0xe1   : > { %p10_p6 = scmp.ge.s32.totalorder %s13_s9, 6  }
  0xe3   :  { %12 = sbr.rel (!%p10_p6) target bundleno = 1 (0x1), region = 59 }
  0xe8   :  { %362 = vsyncpa [#allocation3], 1 }
  0xe9   :  { %364 = vsyncpa [#allocation3 + $0x1], 1 }

</bundles_post_ra>
